<compile_context>
chip_gen: v7x
topology: tpu7x:2x2x1
jax: 0.10.0
libtpu: 0.0.40
codegen_flags: <defaults>
</compile_context>

<pallas_src>
import math

import jax
import jax.numpy as jnp
from jax.experimental import pallas as pl
from jax.experimental.pallas import tpu as pltpu


# ---------------- config (TinyGPTConfig stand-in, small synthetic sizes) ------------
VOCAB_SIZE = 64
N_EMBED = 32
MAX_LEN = 5000
BATCH = 2
SEQ = 8

LANES = 128  # TPU vreg lane width


# ------------------------------- Pallas kernel --------------------------------------
def embedding_stem_kernel(ids_ref, table_ref, pe_ref, out_ref):
    """Single gridless invocation; all operands lane-dense, one block store.

    ids_ref:   (R, 128) int32   token id owning each output element (R = B*T*D/128)
    table_ref: (V, 128) float32 embedding table lane-tiled: column l holds feature l % D
    pe_ref:    (R, 128) float32 positional-encoding slab already in output layout
    out_ref:   (R, 128) float32 lane-dense output (reshaped to (B, T, D) in the wrapper)
    """
    R, L = ids_ref.shape
    V = table_ref.shape[0]

    ids = ids_ref[...]                                            # (R, L) int32
    tbl = table_ref[...]                                          # (V, L) f32

    # Vectorized gather over the vocab axis (exactly one selected term per (r, l)).
    # Out-of-range ids select nothing and yield 0.0 (no silent adjacent-VMEM read).
    vocab_ids = jax.lax.broadcasted_iota(jnp.int32, (V, L), 0)    # row k == k
    onehot = (jnp.broadcast_to(ids[:, None, :], (R, V, L))
              == jnp.broadcast_to(vocab_ids[None, :, :], (R, V, L)))
    selected = jnp.where(onehot, jnp.broadcast_to(tbl[None, :, :], (R, V, L)), 0.0)
    tok = jnp.sum(selected, axis=1)                               # (R, L) gathered embeddings

    # eval-mode forward: tok + (tok + pe[:B]) == 2*tok + pe, folded into adds only.
    out_ref[...] = tok + tok + pe_ref[...]                        # one unmasked block store


def embedding_stem(idx, table, pe_slice):
    """idx: (B, T) int32, table: (V, D) f32, pe_slice: (B, D) f32 -> (B, T, D) f32."""
    B, T = idx.shape
    V, D = table.shape
    BT = B * T
    assert LANES % D == 0 and (BT * D) % LANES == 0, "toy-size lane-packing assumptions"
    pack = LANES // D              # tokens packed per 128-lane output row
    R = BT // pack                 # lane-dense output rows

    # ---- wrapper-side layout plumbing (index / parameter presentation only) --------
    idx_flat = idx.reshape(BT).astype(jnp.int32)
    ids_dense = jnp.repeat(idx_flat, D).reshape(R, LANES)          # token id per element
    table_tiled = jnp.tile(table, (1, pack))                       # (V, 128): col l -> feat l%D
    pe_slab = jnp.broadcast_to(pe_slice[:, None, :], (B, T, D)).reshape(R, LANES)

    out_dense = pl.pallas_call(
        embedding_stem_kernel,
        out_shape=jax.ShapeDtypeStruct((R, LANES), jnp.float32),
        # No grid: one step, all operands VMEM-resident for the kernel's duration.
        in_specs=[
            pl.BlockSpec(memory_space=pltpu.MemorySpace.VMEM),     # ids (lane-dense)
            pl.BlockSpec(memory_space=pltpu.MemorySpace.VMEM),     # lane-tiled table
            pl.BlockSpec(memory_space=pltpu.MemorySpace.VMEM),     # pe slab
        ],
        out_specs=pl.BlockSpec(memory_space=pltpu.MemorySpace.VMEM),
    )(ids_dense, table_tiled, pe_slab)

    # Free row-major reinterpretation back to (B, T, D).
    return out_dense.reshape(B, T, D)


# -------------------------- parameter / buffer construction -------------------------
def make_positional_encoding(d_model, max_len):
    """Mirrors the PyTorch PositionalEncoding buffer construction."""
    position = jnp.arange(0, max_len, dtype=jnp.float32)[:, None]            # (L, 1)
    div_term = jnp.exp(jnp.arange(0, d_model, 2, dtype=jnp.float32)
                       * (-math.log(10000.0) / d_model))                     # (D/2,)
    pe = jnp.zeros((max_len, d_model), dtype=jnp.float32)
    pe = pe.at[:, 0::2].set(jnp.sin(position * div_term))
    pe = pe.at[:, 1::2].set(jnp.cos(position * div_term))
    # PyTorch registers pe as (max_len, 1, d_model); forward adds pe[:x.size(0)],
    # i.e. indexes by the leading (batch) axis. We keep the (max_len, d_model) view.
    return pe


if __name__ == "__main__":
    key = jax.random.PRNGKey(0)
    k_tab, k_idx = jax.random.split(key)

    # nn.Embedding default init: N(0, 1)
    tok_emb_table = jax.random.normal(k_tab, (VOCAB_SIZE, N_EMBED), dtype=jnp.float32)
    pe_full = make_positional_encoding(N_EMBED, MAX_LEN)

    idx = jax.random.randint(k_idx, (BATCH, SEQ), 0, VOCAB_SIZE, dtype=jnp.int32)

    # forward adds pe[:B] (shape (B, 1, D)) to the (B, T, D) token embeddings.
    pe_slice = pe_full[:BATCH]                                               # (B, D)

    out = embedding_stem(idx, tok_emb_table, pe_slice)
    out = jax.block_until_ready(out)

    # pure-JAX reference of the exact PyTorch eval-mode forward
    tok = tok_emb_table[idx]                                                 # (B, T, D)
    ref = 2.0 * tok + pe_slice[:, None, :]
    assert out.shape == (BATCH, SEQ, N_EMBED)
    assert jnp.allclose(out, ref, atol=1e-5, rtol=1e-5), "mismatch vs reference"

    print("KERNEL_OK")
</pallas_src>

<mosaic_0001>
module attributes {stable_mosaic.version = 11 : i64} {
  func.func @embedding_stem_kernel(%arg0: memref<4x128xi32, #tpu.memory_space<vmem>>, %arg1: memref<64x128xf32, #tpu.memory_space<vmem>>, %arg2: memref<4x128xf32, #tpu.memory_space<vmem>>, %arg3: memref<4x128xf32, #tpu.memory_space<vmem>>) attributes {dimension_semantics = [], scalar_prefetch = 0 : i64, scratch_operands = 0 : i64, tpu.core_type = #tpu.core_type<tc>} {
    %c0 = arith.constant 0 : index
    %c0_0 = arith.constant 0 : index
    %0 = vector.load %arg0[%c0, %c0_0] : memref<4x128xi32, #tpu.memory_space<vmem>>, vector<4x128xi32>
    %c0_1 = arith.constant 0 : index
    %c0_2 = arith.constant 0 : index
    %1 = vector.load %arg1[%c0_1, %c0_2] : memref<64x128xf32, #tpu.memory_space<vmem>>, vector<64x128xf32>
    %2 = tpu.iota {dimensions = array<i32: 0>} : vector<64x128xi32>
    %3 = vector.shape_cast %0 : vector<4x128xi32> to vector<4x1x128xi32>
    %4 = vector.shape_cast %3 : vector<4x1x128xi32> to vector<4x1x128xi32>
    %5 = vector.broadcast %4 : vector<4x1x128xi32> to vector<4x64x128xi32>
    %6 = vector.shape_cast %2 : vector<64x128xi32> to vector<1x64x128xi32>
    %7 = vector.shape_cast %6 : vector<1x64x128xi32> to vector<1x64x128xi32>
    %8 = vector.broadcast %7 : vector<1x64x128xi32> to vector<4x64x128xi32>
    %9 = arith.cmpi eq, %5, %8 : vector<4x64x128xi32>
    %10 = vector.shape_cast %1 : vector<64x128xf32> to vector<1x64x128xf32>
    %11 = vector.shape_cast %10 : vector<1x64x128xf32> to vector<1x64x128xf32>
    %12 = vector.broadcast %11 : vector<1x64x128xf32> to vector<4x64x128xf32>
    %cst = arith.constant 0.000000e+00 : f32
    %13 = vector.broadcast %cst : f32 to vector<4x64x128xf32>
    %14 = arith.select %9, %12, %13 : vector<4x64x128xi1>, vector<4x64x128xf32>
    %cst_3 = arith.constant dense<0.000000e+00> : vector<4x128xf32>
    %15 = vector.multi_reduction <add>, %14, %cst_3 [1] : vector<4x64x128xf32> to vector<4x128xf32>
    %16 = arith.addf %15, %15 : vector<4x128xf32>
    %c0_4 = arith.constant 0 : index
    %c0_5 = arith.constant 0 : index
    %17 = vector.load %arg2[%c0_4, %c0_5] : memref<4x128xf32, #tpu.memory_space<vmem>>, vector<4x128xf32>
    %18 = arith.addf %16, %17 : vector<4x128xf32>
    %c0_6 = arith.constant 0 : index
    %c0_7 = arith.constant 0 : index
    %19 = vector.load %arg3[%c0_6, %c0_7] : memref<4x128xf32, #tpu.memory_space<vmem>>, vector<4x128xf32>
    tpu.vector_store %arg3[%c0_6, %c0_7], %18 {strides = array<i32>} : memref<4x128xf32, #tpu.memory_space<vmem>>, vector<4x128xf32>,
    return
  }
}

</mosaic_0001>

<bundles_post_ra>
// kernel: tpu_custom_call.1
= control target key start
LH: loop header
LB: loop body
LE: loop exit
PB: predicated region body
PF: predicated region fallthrough
CT: control target
= control target key end

     0   :  { %8 = vsyncpa [#allocation3], 0  ;;  %s587_s0 = inlined_call_operand.hbm [shape: s32[4,128], index: 0, kind: input, shape index: {}]   ;;  %s588_s1 = inlined_call_operand.hbm [shape: f32[64,128], index: 1, kind: input, shape index: {}]   ;;  %s589_s2 = inlined_call_operand.vmem [shape: f32[4,128], index: 2, kind: input, shape index: {}]   ;;  %s590_s3 = inlined_call_operand.hbm [shape: f32[4,128], index: 3, kind: output, shape index: {}]  }
   0x1   :  { %9 = vsyncpa [#allocation6], 0 }
   0x2   :  { %10 = vsyncpa [#allocation4], 0  ;;  %s342_s12 = smov [#allocation2]   ;;  %s343_s14 = smov [#allocation5]  }
   0x3   :  { %s17_s13 = sshll.u32 %s342_s12, 4  ;;  %s26_s15 = sshll.u32 %s343_s14, 4  ;;  %s18_s13 = int_to_ptr.vmem [resolvable:$true] %s17_s13  ;;  %s368_s15 = int_to_ptr.vmem [resolvable:$true] %s26_s15 }
   0x4   :  { %s270_s18 = scalar_lea.hbm %s587_s0, 64 }
   0x5   :  { %p271_p0 = scmp.ne.s32.totalorder %s587_s0, %s270_s18  ;;  %p274_p1 = scmp.lt.u32.totalorder %s270_s18, %s587_s0 }
   0x7   :  { %p276_p2 = pnand %p274_p1, %p271_p0 }
   0x9   :  { %279 = shalt.err (!%p276_p2)
}
   0xa   :  { %s280_s23 = scalar_lea.vmem %s18_s13, 64  ;;  %p285_p4 = scmp.lt.s32.totalorder %s18_s13, %s18_s13 }
   0xb   :  { %p281_p3 = scmp.ne.s32.totalorder %s18_s13, %s280_s23  ;;  %p286_p5 = scmp.lt.s32.totalorder %s280_s23, %s280_s23 }
   0xd   :  { %p287_p6 = por %p286_p5, %p285_p4 }
   0xf   :  { %p288_p7 = pnand %p287_p6, %p281_p3 }
  0x11   :  { %291 = shalt.err (!%p288_p7)
}
  0x12   :  { %20 = dma.hbm_to_vmem [thread:$0]  %s587_s0, 64, %s18_s13, [#allocation3]  }
  0x13   :  { %s292_s28 = scalar_lea.hbm %s588_s1, 1024 }
  0x14   :  { %p293_p8 = scmp.ne.s32.totalorder %s588_s1, %s292_s28  ;;  %p296_p9 = scmp.lt.u32.totalorder %s292_s28, %s588_s1 }
  0x16   :  { %p298_p10 = pnand %p296_p9, %p293_p8 }
  0x18   :  { %301 = shalt.err (!%p298_p10)
}
  0x19   :  { %s302_s6 = scalar_lea.vmem %s368_s15, 1024  ;;  %p307_p12 = scmp.lt.s32.totalorder %s368_s15, %s368_s15 }
  0x1a   :  { %p303_p11 = scmp.ne.s32.totalorder %s368_s15, %s302_s6  ;;  %p308_p13 = scmp.lt.s32.totalorder %s302_s6, %s302_s6 }
  0x1c   :  { %p309_p0 = por %p308_p13, %p307_p12 }
  0x1e   :  { %p310_p1 = pnand %p309_p0, %p303_p11 }
  0x20   :  { %313 = shalt.err (!%p310_p1)
}
  0x21   :  { %s344_s0 = smov 128   ;;  %s345_s7 = smov 8  }
  0x22   :  { %32 = dma.hbm_to_vmem [thread:$0]  %s588_s1, 1024, %s368_s15, [#allocation6], %s344_s0, %s344_s0, %s345_s7  }
  0x23   :  { %336 = dma.done.wait [#allocation3], 64  }
  0x24   :  { %337 = vsyncadd [#allocation3], 4294967232 }
  0x25   :  { %338 = dma.done.wait [#allocation6], 1024  }
  0x26   :  { %339 = vsyncadd [#allocation6], 4294966272  ;;  %v50_v0 = vlaneseq  ;;  %v346_v1 = vmov 1966171168   ;;  %v42_v24 = vld [vmem:[#allocation5] sm:$0xff]  ;;  %v43_v25 = vld [vmem:[#allocation5 + $0x8] sm:$0xff] }
  0x27   :  { %v68_v2 = vunpack.c.l.s4 %v346_v1  ;;  %v263_v6 = vld.sshfl [vmem:[#allocation2] sm:$0x33 pattern:$0x75316420]  ;;  %v44_v26 = vld [vmem:[#allocation5 + $0x10] sm:$0xff]  ;;  %v46_v40 = vld [vmem:[#allocation5 + $0x20] sm:$0xff] }
  0x28   :  { %v399_v3 = vshrl.u32 %v50_v0, 7  ;;  %v66_v7 = vcombine.high %v263_v6, %v263_v6  ;;  %v45_v33 = vld [vmem:[#allocation5 + $0x18] sm:$0xff]  ;;  %v47_v49 = vld [vmem:[#allocation5 + $0x28] sm:$0xff]  ;;  %v48_v58 = vld [vmem:[#allocation5 + $0x30] sm:$0xff] }
  0x29   :  { %v69_v4 = vunpack.c.0.s8 %v68_v2 }
  0x2a   :  { %v85_v10 = vsub.s32 0, %v399_v3  ;;  %v52_v14 = vadd.s32 8, %v399_v3  ;;  %v53_v15 = vadd.s32 16, %v399_v3  ;;  %v410_v17 = vadd.s32 24, %v399_v3 }
  0x2b   :  { %v72_v5 = vsub.s32 %v69_v4, %v399_v3  ;;  %v413_v18 = vadd.s32 32, %v399_v3  ;;  %v418_v20 = vadd.s32 40, %v399_v3  ;;  %v421_v21 = vadd.s32 48, %v399_v3 }
  0x2c   :  { %v424_v22 = vadd.s32 56, %v399_v3 }
  0x2d   :  { %v73_v8 = vrot.slane %v263_v6, %v72_v5  ;;  %v80_v9 = vrot.slane %v66_v7, %v72_v5 }
  0x2f   :  { %v81_v11 = vcombine.high %v73_v8, %v73_v8  ;;  %v403_v12 = vrot.slane %v73_v8, %v85_v10  ;;  %v82_v13 = vcombine.high %v80_v9, %v80_v9  ;;  %v407_v16 = vrot.slane %v80_v9, %v85_v10 }
  0x31   :  { %v415_v19 = vrot.slane %v81_v11, %v85_v10  ;;  %vm99_vm0 = vcmp.eq.s32.totalorder %v403_v12, %v399_v3  ;;  %v428_v23 = vrot.slane %v82_v13, %v85_v10  ;;  %vm100_vm1 = vcmp.eq.s32.totalorder %v403_v12, %v52_v14 }
  0x32   :  { %vm101_vm2 = vcmp.eq.s32.totalorder %v403_v12, %v53_v15  ;;  %vm107_vm5 = vcmp.eq.s32.totalorder %v407_v16, %v399_v3  ;;  %vm108_vm6 = vcmp.eq.s32.totalorder %v407_v16, %v52_v14  ;;  %vm105_vm15 = vcmp.eq.s32.totalorder %v403_v12, %v421_v21 }
  0x33   :  { %vm115_vm10 = vcmp.eq.s32.totalorder %v415_v19, %v399_v3  ;;  %vm116_vm11 = vcmp.eq.s32.totalorder %v415_v19, %v52_v14  ;;  %vm123_vm8 = vcmp.eq.s32.totalorder %v428_v23, %v399_v3  ;;  %vm124_vm3 = vcmp.eq.s32.totalorder %v428_v23, %v52_v14  ;;  %v49_v3 = vld [vmem:[#allocation5 + $0x38] sm:$0xff] }
  0x34   :  { %vm125_vm12 = vcmp.eq.s32.totalorder %v428_v23, %v53_v15  ;;  %vm126_vm13 = vcmp.eq.s32.totalorder %v428_v23, %v410_v17  ;;  %vm113_vm9 = vcmp.eq.s32.totalorder %v407_v16, %v421_v21  ;;  %vm127_vm14 = vcmp.eq.s32.totalorder %v428_v23, %v413_v18 }
  0x35   :  { %vm128_vm7 = vcmp.eq.s32.totalorder %v428_v23, %v418_v20  ;;  %v131_v27 = vsel %vm99_vm0, %v42_v24, 0.0  ;;  %v132_v28 = vsel %vm100_vm1, %v43_v25, 0.0  ;;  %v139_v29 = vsel %vm107_vm5, %v42_v24, 0.0 }
  0x36   :  { %v140_v30 = vsel %vm108_vm6, %v43_v25, 0.0  ;;  %v147_v31 = vsel %vm115_vm10, %v42_v24, 0.0  ;;  %v148_v32 = vsel %vm116_vm11, %v43_v25, 0.0  ;;  %vm106_vm0 = vcmp.eq.s32.totalorder %v403_v12, %v424_v22 }
  0x37   :  { %vm114_vm1 = vcmp.eq.s32.totalorder %v407_v16, %v424_v22  ;;  %vm122_vm5 = vcmp.eq.s32.totalorder %v415_v19, %v424_v22  ;;  %vm129_vm6 = vcmp.eq.s32.totalorder %v428_v23, %v421_v21  ;;  %vm130_vm4 = vcmp.eq.s32.totalorder %v428_v23, %v424_v22 }
  0x38   :  { %v155_v34 = vsel %vm123_vm8, %v42_v24, 0.0  ;;  %v156_v35 = vsel %vm124_vm3, %v43_v25, 0.0  ;;  %v133_v36 = vsel %vm101_vm2, %v44_v26, 0.0  ;;  %vm591_vm10 = vcmp.eq.s32.totalorder %v407_v16, %v53_v15 }
  0x39   :  { %v141_v37 = vsel %vm591_vm10, %v44_v26, 0.0  ;;  %vm592_vm11 = vcmp.eq.s32.totalorder %v415_v19, %v53_v15  ;;  %v157_v39 = vsel %vm125_vm12, %v44_v26, 0.0  ;;  %v163_v41 = vadd.f32 %v132_v28, %v131_v27 }
  0x3a   :  { %v149_v38 = vsel %vm592_vm11, %v44_v26, 0.0  ;;  %v176_v42 = vadd.f32 %v140_v30, %v139_v29  ;;  %v189_v43 = vadd.f32 %v148_v32, %v147_v31  ;;  %v202_v44 = vadd.f32 %v156_v35, %v155_v34 }
  0x3b   :  { %vm593_vm3 = vcmp.eq.s32.totalorder %v403_v12, %v410_v17  ;;  %vm594_vm2 = vcmp.eq.s32.totalorder %v407_v16, %v410_v17  ;;  %vm595_vm8 = vcmp.eq.s32.totalorder %v415_v19, %v410_v17  ;;  %v158_v48 = vsel %vm126_vm13, %v45_v33, 0.0 }
  0x3c   :  { %v134_v45 = vsel %vm593_vm3, %v45_v33, 0.0  ;;  %v142_v46 = vsel %vm594_vm2, %v45_v33, 0.0  ;;  %v150_v47 = vsel %vm595_vm8, %v45_v33, 0.0  ;;  %v164_v50 = vadd.f32 %v163_v41, %v133_v36 }
  0x3d   :  { %v177_v51 = vadd.f32 %v176_v42, %v141_v37  ;;  %v190_v52 = vadd.f32 %v189_v43, %v149_v38  ;;  %v203_v53 = vadd.f32 %v202_v44, %v157_v39  ;;  %vm596_vm12 = vcmp.eq.s32.totalorder %v403_v12, %v413_v18  ;;  %v219_v44 = vld [vmem:[%s589_s2] sm:$0xf]  ;;  %s347_s2 = smov [#allocation7]  }
  0x3e   :  { %v135_v54 = vsel %vm596_vm12, %v46_v40, 0.0  ;;  %vm597_vm10 = vcmp.eq.s32.totalorder %v407_v16, %v413_v18  ;;  %vm598_vm11 = vcmp.eq.s32.totalorder %v415_v19, %v413_v18  ;;  %v159_v57 = vsel %vm127_vm14, %v46_v40, 0.0  ;;  %s253_s11 = sshll.u32 %s347_s2, 4  ;;  %s254_s11 = int_to_ptr.vmem [resolvable:$true] %s253_s11 }
  0x3f   :  { %v143_v55 = vsel %vm597_vm10, %v46_v40, 0.0  ;;  %v151_v56 = vsel %vm598_vm11, %v46_v40, 0.0  ;;  %v165_v59 = vadd.f32 %v164_v50, %v134_v45  ;;  %v178_v60 = vadd.f32 %v177_v51, %v142_v46  ;;  %s314_s12 = scalar_lea.vmem %s254_s11, 64  ;;  %p319_p3 = scmp.lt.s32.totalorder %s254_s11, %s254_s11 }
  0x40   :  { %v191_v61 = vadd.f32 %v190_v52, %v150_v47  ;;  %v204_v62 = vadd.f32 %v203_v53, %v158_v48  ;;  %vm599_vm13 = vcmp.eq.s32.totalorder %v403_v12, %v418_v20  ;;  %vm600_vm3 = vcmp.eq.s32.totalorder %v407_v16, %v418_v20  ;;  %p315_p2 = scmp.ne.s32.totalorder %s254_s11, %s314_s12  ;;  %p320_p4 = scmp.lt.s32.totalorder %s314_s12, %s314_s12 }
  0x41   :  { %v136_v63 = vsel %vm599_vm13, %v47_v49, 0.0  ;;  %v144_v0 = vsel %vm600_vm3, %v47_v49, 0.0  ;;  %vm601_vm2 = vcmp.eq.s32.totalorder %v415_v19, %v418_v20  ;;  %v160_v2 = vsel %vm128_vm7, %v47_v49, 0.0 }
  0x42   :  { %v152_v1 = vsel %vm601_vm2, %v47_v49, 0.0  ;;  %v166_v4 = vadd.f32 %v165_v59, %v135_v54  ;;  %v179_v5 = vadd.f32 %v178_v60, %v143_v55  ;;  %v192_v6 = vadd.f32 %v191_v61, %v151_v56  ;;  %p321_p5 = por %p320_p4, %p319_p3 }
  0x43   :  { %v205_v7 = vadd.f32 %v204_v62, %v159_v57  ;;  %v137_v8 = vsel %vm105_vm15, %v48_v58, 0.0  ;;  %v145_v9 = vsel %vm113_vm9, %v48_v58, 0.0  ;;  %vm602_vm14 = vcmp.eq.s32.totalorder %v415_v19, %v421_v21 }
  0x44   :  { %v153_v10 = vsel %vm602_vm14, %v48_v58, 0.0  ;;  %v161_v11 = vsel %vm129_vm6, %v48_v58, 0.0  ;;  %v167_v13 = vadd.f32 %v166_v4, %v136_v63  ;;  %v180_v14 = vadd.f32 %v179_v5, %v144_v0  ;;  %p322_p6 = pnand %p321_p5, %p315_p2 }
  0x45   :  { %v193_v15 = vadd.f32 %v192_v6, %v152_v1  ;;  %v206_v17 = vadd.f32 %v205_v7, %v160_v2  ;;  %v138_v18 = vsel %vm106_vm0, %v49_v3, 0.0  ;;  %v146_v20 = vsel %vm114_vm1, %v49_v3, 0.0 }
  0x46   :  { %v154_v24 = vsel %vm122_vm5, %v49_v3, 0.0  ;;  %v162_v21 = vsel %vm130_vm4, %v49_v3, 0.0  ;;  %v168_v25 = vadd.f32 %v167_v13, %v137_v8  ;;  %v181_v26 = vadd.f32 %v180_v14, %v145_v9 }
  0x47   :  { %v194_v27 = vadd.f32 %v193_v15, %v153_v10  ;;  %v207_v28 = vadd.f32 %v206_v17, %v161_v11  ;;  %v221_v49 = vrot.slane %v219_v44, 1  ;;  %v222_v50 = vrot.slane %v219_v44, 2 }
  0x48   :  { %v169_v29 = vadd.f32 %v168_v25, %v138_v18  ;;  %v182_v30 = vadd.f32 %v181_v26, %v146_v20  ;;  %v223_v51 = vrot.slane %v219_v44, 3  ;;  %vm237_vm4 = vcmask 1041409  }
  0x49   :  { %v195_v12 = vadd.f32 %v194_v27, %v154_v24  ;;  %v208_v31 = vadd.f32 %v207_v28, %v162_v21  ;;  %vm240_vm7 = vcmask 1042434   ;;  %vm243_vm9 = vcmask 1043459  }
  0x4a   :  { %v170_v32 = vrot.slane %v169_v29, 4  ;;  %v183_v33 = vrot.slane %v182_v30, 4 }
  0x4b   :  { %v196_v16 = vrot.slane %v195_v12, 4  ;;  %v209_v34 = vrot.slane %v208_v31, 4 }
  0x4c   :  { %v171_v35 = vadd.f32 %v170_v32, %v169_v29  ;;  %v184_v36 = vadd.f32 %v183_v33, %v182_v30 }
  0x4d   :  { %v197_v19 = vadd.f32 %v196_v16, %v195_v12  ;;  %v210_v37 = vadd.f32 %v209_v34, %v208_v31 }
  0x4e   :  { %v172_v38 = vrot.slane %v171_v35, 2  ;;  %v185_v39 = vrot.slane %v184_v36, 2 }
  0x4f   :  { %v198_v22 = vrot.slane %v197_v19, 2  ;;  %v211_v23 = vrot.slane %v210_v37, 2 }
  0x50   :  { %v173_v40 = vadd.f32 %v172_v38, %v171_v35  ;;  %v186_v41 = vadd.f32 %v185_v39, %v184_v36 }
  0x51   :  { %v199_v42 = vadd.f32 %v198_v22, %v197_v19  ;;  %v212_v43 = vadd.f32 %v211_v23, %v210_v37 }
  0x52   :  { %v174_v45 = vrot.slane %v173_v40, 1  ;;  %v187_v46 = vrot.slane %v186_v41, 1 }
  0x53   :  { %v200_v47 = vrot.slane %v199_v42, 1  ;;  %v213_v48 = vrot.slane %v212_v43, 1 }
  0x54   :  { %v175_v52 = vadd.f32 %v174_v45, %v173_v40  ;;  %v188_v53 = vadd.f32 %v187_v46, %v186_v41 }
  0x55   :  { %v201_v54 = vadd.f32 %v200_v47, %v199_v42  ;;  %v214_v55 = vadd.f32 %v213_v48, %v212_v43 }
  0x56   :  { %v215_v56 = vadd.f32 %v175_v52, %v175_v52  ;;  %v216_v57 = vadd.f32 %v188_v53, %v188_v53 }
  0x57   :  { %v217_v58 = vadd.f32 %v201_v54, %v201_v54  ;;  %v218_v59 = vadd.f32 %v214_v55, %v214_v55 }
  0x58   :  { %v228_v60 = vadd.f32 %v219_v44, %v215_v56  ;;  %v229_v61 = vadd.f32 %v221_v49, %v216_v57 }
  0x59   :  { %v230_v62 = vadd.f32 %v222_v50, %v217_v58  ;;  %v231_v63 = vadd.f32 %v223_v51, %v218_v59 }
  0x5a   :  { %v236_v0 = vrot.slane %v229_v61, 7 }
  0x5b   :  { %v239_v1 = vrot.slane %v230_v62, 6  ;;  %v242_v2 = vrot.slane %v231_v63, 5 }
  0x5c   :  { %v238_v3 = vsel %vm237_vm4, %v236_v0, %v228_v60 }
  0x5d   :  { %v241_v4 = vsel %vm240_vm7, %v239_v1, %v238_v3 }
  0x5e   :  { %v244_v5 = vsel %vm243_vm9, %v242_v2, %v241_v4 }
  0x5f   :  { %246 = vst [vmem:[#allocation7] sm:$0xf] %v244_v5 }
  0x60   :  { %325 = shalt.err (!%p322_p6)
}
  0x61   :  { %s326_s15 = scalar_lea.hbm %s590_s3, 64 }
  0x62   :  { %p327_p7 = scmp.ne.s32.totalorder %s590_s3, %s326_s15  ;;  %p330_p8 = scmp.lt.u32.totalorder %s326_s15, %s590_s3 }
  0x64   :  { %p332_p9 = pnand %p330_p8, %p327_p7 }
  0x66   :  { %335 = shalt.err (!%p332_p9)
}
  0x67   :  { %256 = dma.vmem_to_hbm [thread:$0]  %s254_s11, 64, %s590_s3, [#allocation4]  }
  0x68   :  { %340 = dma.done.wait [#allocation4], 64  }
  0x69   :  { %341 = vsyncadd [#allocation4], 4294967232 }
  0x6a   :  { %260 = vsyncpa [#allocation3], 1 }
  0x6b   :  { %261 = vsyncpa [#allocation6], 1 }
  0x6c   :  { %262 = vsyncpa [#allocation4], 1 }

</bundles_post_ra>
